<compile_context>
chip_gen: v7x
topology: tpu7x:2x2x1
jax: 0.10.0
libtpu: 0.0.40
codegen_flags: <defaults>
</compile_context>

<pallas_src>
import math
from functools import partial

import jax
import jax.numpy as jnp
from jax import lax
from jax.experimental import pallas as pl
from jax.experimental.pallas import tpu as pltpu

LANE = 128
MAX_CHUNK = 256          # steps per grid iteration (multiple of 8; 256 fills v6e/v7x MXU rows)


def _round_up(n, m):
    return ((n + m - 1) // m) * m


def rnn_seq_kernel(toks_ref,       # SMEM (T_pad,) int32     -- scalar-prefetched token ids
                   embproj_ref,    # VMEM (V, H_pad)         -- Emb@W_ih^T + b_ih + b_hh (resident)
                   h0_ref,         # VMEM (1, H_pad)         -- initial hidden state
                   whh_ref,        # VMEM (H_pad, H_pad)     -- W_hh^T
                   wdec_ref,       # VMEM (H_pad, O_pad)     -- W_dec^T
                   bdec_ref,       # VMEM (1, O_pad)         -- b_dec
                   logits_ref,     # VMEM out (C, O_pad)     -- logits for this chunk
                   hfin_ref,       # VMEM out (1, H_pad)     -- final hidden state (resident)
                   h_carry,        # VMEM scratch (1, H_pad) -- h carried across chunks
                   h_slab,         # VMEM scratch (C, H_pad) -- per-step h of this chunk
                   *, seq_len, chunk):
    c = pl.program_id(0)
    base = c * chunk

    @pl.when(c == 0)
    def _init():
        h_carry[...] = h0_ref[...]

    def step(i, h):
        idx = base + i
        tok = toks_ref[idx]
        # serial path: one K=128, M=1 matmul + add + tanh; input projection is a table row.
        pre = embproj_ref[pl.ds(tok, 1), :] + jnp.dot(
            h, whh_ref[...], preferred_element_type=jnp.float32)
        h_new = jnp.tanh(pre)                       # padded lanes stay exactly 0
        h_slab[pl.ds(i, 1), :] = h_new              # row for the batched decoder matmul
        if seq_len % chunk != 0:                    # static: only if the tail is padded
            h_new = jnp.where(idx < seq_len, h_new, h)
        return h_new

    h_fin = lax.fori_loop(0, chunk, step, h_carry[...], unroll=8)
    h_carry[...] = h_fin

    @pl.when(c == pl.num_programs(0) - 1)
    def _fin():
        hfin_ref[...] = h_fin

    # One batched (C, H_pad) @ (H_pad, O_pad) decoder matmul per chunk, unmasked tile stores.
    logits_ref[...] = (jnp.dot(h_slab[...], wdec_ref[...],
                               preferred_element_type=jnp.float32)
                       + bdec_ref[...])


def init_params(key, input_size, embedding_size, hidden_size, output_size):
    """PyTorch-layer-shaped parameters (weights stored transposed: (in, out))."""
    ks = jax.random.split(key, 7)
    k = 1.0 / math.sqrt(hidden_size)
    return {
        "embedding": jax.random.normal(ks[0], (input_size, embedding_size), jnp.float32),
        "w_ih_t": jax.random.uniform(ks[1], (embedding_size, hidden_size), jnp.float32, -k, k),
        "w_hh_t": jax.random.uniform(ks[2], (hidden_size, hidden_size), jnp.float32, -k, k),
        "b_ih": jax.random.uniform(ks[3], (1, hidden_size), jnp.float32, -k, k),
        "b_hh": jax.random.uniform(ks[4], (1, hidden_size), jnp.float32, -k, k),
        "w_dec_t": jax.random.uniform(ks[5], (hidden_size, output_size), jnp.float32, -k, k),
        "b_dec": jax.random.uniform(ks[6], (1, output_size), jnp.float32, -k, k),
    }


def prepare_kernel_params(params):
    """One-time fusion/padding into kernel layout (outside the hot path).

    Folds Embedding @ W_ih^T + (b_ih + b_hh) into a single (V, H_pad) lookup table so the
    entire input projection disappears from the serial recurrence."""
    V, E = params["embedding"].shape
    H = params["w_hh_t"].shape[0]
    O = params["w_dec_t"].shape[1]
    H_pad, O_pad = _round_up(H, LANE), _round_up(O, LANE)

    hp = jax.lax.Precision.HIGHEST
    emb_proj = (jnp.dot(params["embedding"], params["w_ih_t"], precision=hp)
                + params["b_ih"] + params["b_hh"])                      # (V, H)
    embproj_p = jnp.zeros((V, H_pad), jnp.float32).at[:, :H].set(emb_proj)

    whh_p = jnp.zeros((H_pad, H_pad), jnp.float32).at[:H, :H].set(params["w_hh_t"])
    wdec_p = jnp.zeros((H_pad, O_pad), jnp.float32).at[:H, :O].set(params["w_dec_t"])
    bdec_p = jnp.zeros((1, O_pad), jnp.float32).at[:, :O].set(params["b_dec"])

    return {
        "emb_proj": embproj_p, "w_hh": whh_p, "w_dec": wdec_p, "b_dec": bdec_p,
        "dims": (H, O, H_pad, O_pad), "vocab": V,
    }


def rnn_sequence_forward(kparams, tokens, hidden):
    """Run T chained RNNModel.forward steps in one fused Pallas kernel.

    tokens: (T,) int32 token indices; hidden: (1, 1, H) float32.
    Returns (logits (T, O), final hidden (1, 1, H))."""
    H, O, H_pad, O_pad = kparams["dims"]
    V = kparams["vocab"]
    T = int(tokens.shape[0])

    C = min(MAX_CHUNK, _round_up(T, 8))        # steps per grid iteration (multiple of 8)
    T_pad = _round_up(T, C)
    n_chunks = T_pad // C

    # Clamp + pad token ids (VMEM refs have no runtime bounds check on the table gather).
    toks = jnp.clip(tokens.astype(jnp.int32), 0, V - 1)
    toks_p = jnp.zeros((T_pad,), jnp.int32).at[:T].set(toks)

    h0_p = jnp.zeros((1, H_pad), jnp.float32).at[:, :H].set(hidden.reshape(1, H))

    const = lambda c, toks: (0, 0)             # weights / state stay resident across chunks
    grid_spec = pltpu.PrefetchScalarGridSpec(
        num_scalar_prefetch=1,
        grid=(n_chunks,),
        in_specs=[
            pl.BlockSpec((V, H_pad), const),           # fused input-projection table
            pl.BlockSpec((1, H_pad), const),           # h0
            pl.BlockSpec((H_pad, H_pad), const),       # W_hh^T
            pl.BlockSpec((H_pad, O_pad), const),       # decoder weight
            pl.BlockSpec((1, O_pad), const),           # decoder bias
        ],
        out_specs=(
            pl.BlockSpec((C, O_pad), lambda c, toks: (c, 0)),   # logits, chunked over grid
            pl.BlockSpec((1, H_pad), const),                    # final hidden (resident)
        ),
        scratch_shapes=[pltpu.VMEM((1, H_pad), jnp.float32),    # h carry across chunks
                        pltpu.VMEM((C, H_pad), jnp.float32)],   # per-chunk hidden slab
    )

    logits_p, hfin_p = pl.pallas_call(
        partial(rnn_seq_kernel, seq_len=T, chunk=C),
        out_shape=(jax.ShapeDtypeStruct((T_pad, O_pad), jnp.float32),
                   jax.ShapeDtypeStruct((1, H_pad), jnp.float32)),
        grid_spec=grid_spec,
        compiler_params=pltpu.CompilerParams(
            dimension_semantics=("arbitrary",)),       # recurrence -> sequential chunk axis
    )(toks_p, kparams["emb_proj"], h0_p, kparams["w_hh"],
      kparams["w_dec"], kparams["b_dec"])

    return logits_p[:T, :O], hfin_p[:, :H].reshape(1, 1, H)


def rnn_model_forward(kparams, token_idx, hidden):
    """Single-step API matching RNNModel.forward: returns (out (1, O), hidden (1, 1, H))."""
    return rnn_sequence_forward(kparams, token_idx.reshape(-1), hidden)


# ---------------- pure-JAX reference ----------------
def rnn_step_ref(params, token_idx, hidden):
    hp = jax.lax.Precision.HIGHEST
    x = jnp.take(params["embedding"], token_idx.reshape(-1), axis=0)
    h0 = hidden.reshape(1, -1)
    h_new = jnp.tanh(jnp.dot(x, params["w_ih_t"], precision=hp) + params["b_ih"]
                     + jnp.dot(h0, params["w_hh_t"], precision=hp) + params["b_hh"])
    out = jnp.dot(h_new, params["w_dec_t"], precision=hp) + params["b_dec"]
    return out, h_new.reshape(1, 1, -1)


if __name__ == "__main__":
    # Sizes implied by the module: vocab=len(string.printable)=100, E=70, H=100, O=100.
    input_size, embedding_size, hidden_size, output_size = 100, 70, 100, 100

    key = jax.random.PRNGKey(0)
    k_params, k_tok = jax.random.split(key)
    params = init_params(k_params, input_size, embedding_size, hidden_size, output_size)
    kparams = prepare_kernel_params(params)

    hidden0 = jnp.zeros((1, 1, hidden_size), jnp.float32)   # init_hidden()

    # ---- single-step forward (exact RNNModel.forward semantics) ----
    token = jax.random.randint(k_tok, (1,), 0, input_size, dtype=jnp.int32)
    out1, hid1 = rnn_model_forward(kparams, token, hidden0)
    out1 = jax.block_until_ready(out1)
    hid1 = jax.block_until_ready(hid1)
    out1_ref, hid1_ref = rnn_step_ref(params, token, hidden0)
    assert out1.shape == (1, output_size)
    assert hid1.shape == (1, 1, hidden_size)
    assert jnp.allclose(out1, out1_ref, atol=1e-4, rtol=1e-4)
    assert jnp.allclose(hid1, hid1_ref, atol=1e-4, rtol=1e-4)

    # ---- fused multi-step sequence: T chained forward() calls in ONE kernel ----
    T = 16
    tokens = jax.random.randint(jax.random.PRNGKey(42), (T,), 0, input_size, dtype=jnp.int32)
    outs, hidT = rnn_sequence_forward(kparams, tokens, hidden0)
    outs = jax.block_until_ready(outs)
    hidT = jax.block_until_ready(hidT)

    h = hidden0
    ref_rows = []
    for i in range(T):
        o, h = rnn_step_ref(params, tokens[i:i + 1], h)
        ref_rows.append(o)
    outs_ref = jnp.concatenate(ref_rows, axis=0)

    assert outs.shape == (T, output_size)
    assert hidT.shape == (1, 1, hidden_size)
    assert jnp.allclose(outs, outs_ref, atol=1e-4, rtol=1e-4)
    assert jnp.allclose(hidT, h, atol=1e-4, rtol=1e-4)

    # ---- a longer sequence that exercises multiple chunks + tail masking ----
    T2 = 300                                      # > MAX_CHUNK, not a multiple of it
    tokens2 = jax.random.randint(jax.random.PRNGKey(7), (T2,), 0, input_size, dtype=jnp.int32)
    outs2, hidT2 = rnn_sequence_forward(kparams, tokens2, hidden0)
    outs2 = jax.block_until_ready(outs2)
    hidT2 = jax.block_until_ready(hidT2)
    h2 = hidden0
    ref2 = []
    for i in range(T2):
        o, h2 = rnn_step_ref(params, tokens2[i:i + 1], h2)
        ref2.append(o)
    outs2_ref = jnp.concatenate(ref2, axis=0)
    assert outs2.shape == (T2, output_size)
    assert jnp.allclose(outs2, outs2_ref, atol=1e-3, rtol=1e-3)   # longer chain -> looser tol
    assert jnp.allclose(hidT2, h2, atol=1e-3, rtol=1e-3)

    print("KERNEL_OK")
</pallas_src>

<mosaic_0001>
module attributes {stable_mosaic.version = 11 : i64} {
  func.func @rnn_seq_kernel(%arg0: i32, %arg1: memref<8xi32, #tpu.memory_space<smem>>, %arg2: memref<100x128xf32, #tpu.memory_space<vmem>>, %arg3: memref<1x128xf32, #tpu.memory_space<vmem>>, %arg4: memref<128x128xf32, #tpu.memory_space<vmem>>, %arg5: memref<128x128xf32, #tpu.memory_space<vmem>>, %arg6: memref<1x128xf32, #tpu.memory_space<vmem>>, %arg7: memref<8x128xf32, #tpu.memory_space<vmem>>, %arg8: memref<1x128xf32, #tpu.memory_space<vmem>>, %arg9: memref<1x128xf32, #tpu.memory_space<vmem>>, %arg10: memref<8x128xf32, #tpu.memory_space<vmem>>) attributes {dimension_semantics = [#tpu.dimension_semantics<arbitrary>], iteration_bounds = array<i64: 1>, scalar_prefetch = 1 : i64, scratch_operands = 2 : i64, tpu.core_type = #tpu.core_type<tc>, window_params = [{pipeline_mode = #tpu.pipeline_mode<synchronous>, transform_indices = @transform_0, window_bounds = array<i64: 100, 128>}, {pipeline_mode = #tpu.pipeline_mode<synchronous>, transform_indices = @transform_1, window_bounds = array<i64: 1, 128>}, {pipeline_mode = #tpu.pipeline_mode<synchronous>, transform_indices = @transform_2, window_bounds = array<i64: 128, 128>}, {pipeline_mode = #tpu.pipeline_mode<synchronous>, transform_indices = @transform_3, window_bounds = array<i64: 128, 128>}, {pipeline_mode = #tpu.pipeline_mode<synchronous>, transform_indices = @transform_4, window_bounds = array<i64: 1, 128>}, {transform_indices = @transform_5, window_bounds = array<i64: 8, 128>}, {pipeline_mode = #tpu.pipeline_mode<synchronous>, transform_indices = @transform_6, window_bounds = array<i64: 1, 128>}]} {
    %c8_i32 = arith.constant 8 : i32
    %0 = arith.muli %arg0, %c8_i32 : i32
    %c0_i32 = arith.constant 0 : i32
    %1 = arith.cmpi eq, %arg0, %c0_i32 : i32
    %2 = arith.extui %1 : i1 to i32
    %c0_i32_0 = arith.constant 0 : i32
    %3 = arith.cmpi ne, %2, %c0_i32_0 : i32
    scf.if %3 {
      %c0_64 = arith.constant 0 : index
      %c0_65 = arith.constant 0 : index
      %120 = vector.load %arg3[%c0_64, %c0_65] : memref<1x128xf32, #tpu.memory_space<vmem>>, vector<1x128xf32>
      %c0_66 = arith.constant 0 : index
      %c0_67 = arith.constant 0 : index
      %121 = vector.load %arg9[%c0_66, %c0_67] : memref<1x128xf32, #tpu.memory_space<vmem>>, vector<1x128xf32>
      tpu.vector_store %arg9[%c0_66, %c0_67], %120 {strides = array<i32>} : memref<1x128xf32, #tpu.memory_space<vmem>>, vector<1x128xf32>,
    } else {
    }
    %c0 = arith.constant 0 : index
    %c0_1 = arith.constant 0 : index
    %4 = vector.load %arg9[%c0, %c0_1] : memref<1x128xf32, #tpu.memory_space<vmem>>, vector<1x128xf32>
    %c0_i32_2 = arith.constant 0 : i32
    %5 = arith.addi %0, %c0_i32_2 : i32
    %6 = arith.index_cast %5 : i32 to index
    %7 = memref.load %arg1[%6] : memref<8xi32, #tpu.memory_space<smem>>
    %8 = arith.index_cast %7 : i32 to index
    %c0_3 = arith.constant 0 : index
    %9 = vector.load %arg2[%8, %c0_3] : memref<100x128xf32, #tpu.memory_space<vmem>>, vector<1x128xf32>
    %c0_4 = arith.constant 0 : index
    %c0_5 = arith.constant 0 : index
    %10 = vector.load %arg4[%c0_4, %c0_5] : memref<128x128xf32, #tpu.memory_space<vmem>>, vector<128x128xf32>
    %cst = arith.constant dense<0.000000e+00> : vector<1x128xf32>
    %11 = tpu.matmul %4, %10, %cst {dimension_numbers = #tpu.dot_dimension_numbers<[1], [0], [0], [1], [0, 0, 1, 1], [], []>} : vector<1x128xf32>, vector<128x128xf32>, vector<1x128xf32> -> vector<1x128xf32>
    %12 = arith.addf %9, %11 : vector<1x128xf32>
    %13 = math.tanh %12 : vector<1x128xf32>
    %14 = arith.index_cast %c0_i32_2 : i32 to index
    %c0_6 = arith.constant 0 : index
    %15 = vector.load %arg10[%14, %c0_6] : memref<8x128xf32, #tpu.memory_space<vmem>>, vector<1x128xf32>
    tpu.vector_store %arg10[%14, %c0_6], %13 {strides = array<i32>} : memref<8x128xf32, #tpu.memory_space<vmem>>, vector<1x128xf32>,
    %c1_i32 = arith.constant 1 : i32
    %16 = arith.cmpi slt, %5, %c1_i32 : i32
    %17 = arith.select %16, %13, %4 : vector<1x128xf32>
    %c1_i32_7 = arith.constant 1 : i32
    %18 = arith.addi %0, %c1_i32_7 : i32
    %19 = arith.index_cast %18 : i32 to index
    %20 = memref.load %arg1[%19] : memref<8xi32, #tpu.memory_space<smem>>
    %21 = arith.index_cast %20 : i32 to index
    %c0_8 = arith.constant 0 : index
    %22 = vector.load %arg2[%21, %c0_8] : memref<100x128xf32, #tpu.memory_space<vmem>>, vector<1x128xf32>
    %c0_9 = arith.constant 0 : index
    %c0_10 = arith.constant 0 : index
    %23 = vector.load %arg4[%c0_9, %c0_10] : memref<128x128xf32, #tpu.memory_space<vmem>>, vector<128x128xf32>
    %cst_11 = arith.constant dense<0.000000e+00> : vector<1x128xf32>
    %24 = tpu.matmul %17, %23, %cst_11 {dimension_numbers = #tpu.dot_dimension_numbers<[1], [0], [0], [1], [0, 0, 1, 1], [], []>} : vector<1x128xf32>, vector<128x128xf32>, vector<1x128xf32> -> vector<1x128xf32>
    %25 = arith.addf %22, %24 : vector<1x128xf32>
    %26 = math.tanh %25 : vector<1x128xf32>
    %27 = arith.index_cast %c1_i32_7 : i32 to index
    %c0_12 = arith.constant 0 : index
    %28 = vector.load %arg10[%27, %c0_12] : memref<8x128xf32, #tpu.memory_space<vmem>>, vector<1x128xf32>
    tpu.vector_store %arg10[%27, %c0_12], %26 {strides = array<i32>} : memref<8x128xf32, #tpu.memory_space<vmem>>, vector<1x128xf32>,
    %c1_i32_13 = arith.constant 1 : i32
    %29 = arith.cmpi slt, %18, %c1_i32_13 : i32
    %30 = arith.select %29, %26, %17 : vector<1x128xf32>
    %c2_i32 = arith.constant 2 : i32
    %31 = arith.addi %0, %c2_i32 : i32
    %32 = arith.index_cast %31 : i32 to index
    %33 = memref.load %arg1[%32] : memref<8xi32, #tpu.memory_space<smem>>
    %34 = arith.index_cast %33 : i32 to index
    %c0_14 = arith.constant 0 : index
    %35 = vector.load %arg2[%34, %c0_14] : memref<100x128xf32, #tpu.memory_space<vmem>>, vector<1x128xf32>
    %c0_15 = arith.constant 0 : index
    %c0_16 = arith.constant 0 : index
    %36 = vector.load %arg4[%c0_15, %c0_16] : memref<128x128xf32, #tpu.memory_space<vmem>>, vector<128x128xf32>
    %cst_17 = arith.constant dense<0.000000e+00> : vector<1x128xf32>
    %37 = tpu.matmul %30, %36, %cst_17 {dimension_numbers = #tpu.dot_dimension_numbers<[1], [0], [0], [1], [0, 0, 1, 1], [], []>} : vector<1x128xf32>, vector<128x128xf32>, vector<1x128xf32> -> vector<1x128xf32>
    %38 = arith.addf %35, %37 : vector<1x128xf32>
    %39 = math.tanh %38 : vector<1x128xf32>
    %40 = arith.index_cast %c2_i32 : i32 to index
    %c0_18 = arith.constant 0 : index
    %41 = vector.load %arg10[%40, %c0_18] : memref<8x128xf32, #tpu.memory_space<vmem>>, vector<1x128xf32>
    tpu.vector_store %arg10[%40, %c0_18], %39 {strides = array<i32>} : memref<8x128xf32, #tpu.memory_space<vmem>>, vector<1x128xf32>,
    %c1_i32_19 = arith.constant 1 : i32
    %42 = arith.cmpi slt, %31, %c1_i32_19 : i32
    %43 = arith.select %42, %39, %30 : vector<1x128xf32>
    %c3_i32 = arith.constant 3 : i32
    %44 = arith.addi %0, %c3_i32 : i32
    %45 = arith.index_cast %44 : i32 to index
    %46 = memref.load %arg1[%45] : memref<8xi32, #tpu.memory_space<smem>>
    %47 = arith.index_cast %46 : i32 to index
    %c0_20 = arith.constant 0 : index
    %48 = vector.load %arg2[%47, %c0_20] : memref<100x128xf32, #tpu.memory_space<vmem>>, vector<1x128xf32>
    %c0_21 = arith.constant 0 : index
    %c0_22 = arith.constant 0 : index
    %49 = vector.load %arg4[%c0_21, %c0_22] : memref<128x128xf32, #tpu.memory_space<vmem>>, vector<128x128xf32>
    %cst_23 = arith.constant dense<0.000000e+00> : vector<1x128xf32>
    %50 = tpu.matmul %43, %49, %cst_23 {dimension_numbers = #tpu.dot_dimension_numbers<[1], [0], [0], [1], [0, 0, 1, 1], [], []>} : vector<1x128xf32>, vector<128x128xf32>, vector<1x128xf32> -> vector<1x128xf32>
    %51 = arith.addf %48, %50 : vector<1x128xf32>
    %52 = math.tanh %51 : vector<1x128xf32>
    %53 = arith.index_cast %c3_i32 : i32 to index
    %c0_24 = arith.constant 0 : index
    %54 = vector.load %arg10[%53, %c0_24] : memref<8x128xf32, #tpu.memory_space<vmem>>, vector<1x128xf32>
    tpu.vector_store %arg10[%53, %c0_24], %52 {strides = array<i32>} : memref<8x128xf32, #tpu.memory_space<vmem>>, vector<1x128xf32>,
    %c1_i32_25 = arith.constant 1 : i32
    %55 = arith.cmpi slt, %44, %c1_i32_25 : i32
    %56 = arith.select %55, %52, %43 : vector<1x128xf32>
    %c4_i32 = arith.constant 4 : i32
    %57 = arith.addi %0, %c4_i32 : i32
    %58 = arith.index_cast %57 : i32 to index
    %59 = memref.load %arg1[%58] : memref<8xi32, #tpu.memory_space<smem>>
    %60 = arith.index_cast %59 : i32 to index
    %c0_26 = arith.constant 0 : index
    %61 = vector.load %arg2[%60, %c0_26] : memref<100x128xf32, #tpu.memory_space<vmem>>, vector<1x128xf32>
    %c0_27 = arith.constant 0 : index
    %c0_28 = arith.constant 0 : index
    %62 = vector.load %arg4[%c0_27, %c0_28] : memref<128x128xf32, #tpu.memory_space<vmem>>, vector<128x128xf32>
    %cst_29 = arith.constant dense<0.000000e+00> : vector<1x128xf32>
    %63 = tpu.matmul %56, %62, %cst_29 {dimension_numbers = #tpu.dot_dimension_numbers<[1], [0], [0], [1], [0, 0, 1, 1], [], []>} : vector<1x128xf32>, vector<128x128xf32>, vector<1x128xf32> -> vector<1x128xf32>
    %64 = arith.addf %61, %63 : vector<1x128xf32>
    %65 = math.tanh %64 : vector<1x128xf32>
    %66 = arith.index_cast %c4_i32 : i32 to index
    %c0_30 = arith.constant 0 : index
    %67 = vector.load %arg10[%66, %c0_30] : memref<8x128xf32, #tpu.memory_space<vmem>>, vector<1x128xf32>
    tpu.vector_store %arg10[%66, %c0_30], %65 {strides = array<i32>} : memref<8x128xf32, #tpu.memory_space<vmem>>, vector<1x128xf32>,
    %c1_i32_31 = arith.constant 1 : i32
    %68 = arith.cmpi slt, %57, %c1_i32_31 : i32
    %69 = arith.select %68, %65, %56 : vector<1x128xf32>
    %c5_i32 = arith.constant 5 : i32
    %70 = arith.addi %0, %c5_i32 : i32
    %71 = arith.index_cast %70 : i32 to index
    %72 = memref.load %arg1[%71] : memref<8xi32, #tpu.memory_space<smem>>
    %73 = arith.index_cast %72 : i32 to index
    %c0_32 = arith.constant 0 : index
    %74 = vector.load %arg2[%73, %c0_32] : memref<100x128xf32, #tpu.memory_space<vmem>>, vector<1x128xf32>
    %c0_33 = arith.constant 0 : index
    %c0_34 = arith.constant 0 : index
    %75 = vector.load %arg4[%c0_33, %c0_34] : memref<128x128xf32, #tpu.memory_space<vmem>>, vector<128x128xf32>
    %cst_35 = arith.constant dense<0.000000e+00> : vector<1x128xf32>
    %76 = tpu.matmul %69, %75, %cst_35 {dimension_numbers = #tpu.dot_dimension_numbers<[1], [0], [0], [1], [0, 0, 1, 1], [], []>} : vector<1x128xf32>, vector<128x128xf32>, vector<1x128xf32> -> vector<1x128xf32>
    %77 = arith.addf %74, %76 : vector<1x128xf32>
    %78 = math.tanh %77 : vector<1x128xf32>
    %79 = arith.index_cast %c5_i32 : i32 to index
    %c0_36 = arith.constant 0 : index
    %80 = vector.load %arg10[%79, %c0_36] : memref<8x128xf32, #tpu.memory_space<vmem>>, vector<1x128xf32>
    tpu.vector_store %arg10[%79, %c0_36], %78 {strides = array<i32>} : memref<8x128xf32, #tpu.memory_space<vmem>>, vector<1x128xf32>,
    %c1_i32_37 = arith.constant 1 : i32
    %81 = arith.cmpi slt, %70, %c1_i32_37 : i32
    %82 = arith.select %81, %78, %69 : vector<1x128xf32>
    %c6_i32 = arith.constant 6 : i32
    %83 = arith.addi %0, %c6_i32 : i32
    %84 = arith.index_cast %83 : i32 to index
    %85 = memref.load %arg1[%84] : memref<8xi32, #tpu.memory_space<smem>>
    %86 = arith.index_cast %85 : i32 to index
    %c0_38 = arith.constant 0 : index
    %87 = vector.load %arg2[%86, %c0_38] : memref<100x128xf32, #tpu.memory_space<vmem>>, vector<1x128xf32>
    %c0_39 = arith.constant 0 : index
    %c0_40 = arith.constant 0 : index
    %88 = vector.load %arg4[%c0_39, %c0_40] : memref<128x128xf32, #tpu.memory_space<vmem>>, vector<128x128xf32>
    %cst_41 = arith.constant dense<0.000000e+00> : vector<1x128xf32>
    %89 = tpu.matmul %82, %88, %cst_41 {dimension_numbers = #tpu.dot_dimension_numbers<[1], [0], [0], [1], [0, 0, 1, 1], [], []>} : vector<1x128xf32>, vector<128x128xf32>, vector<1x128xf32> -> vector<1x128xf32>
    %90 = arith.addf %87, %89 : vector<1x128xf32>
    %91 = math.tanh %90 : vector<1x128xf32>
    %92 = arith.index_cast %c6_i32 : i32 to index
    %c0_42 = arith.constant 0 : index
    %93 = vector.load %arg10[%92, %c0_42] : memref<8x128xf32, #tpu.memory_space<vmem>>, vector<1x128xf32>
    tpu.vector_store %arg10[%92, %c0_42], %91 {strides = array<i32>} : memref<8x128xf32, #tpu.memory_space<vmem>>, vector<1x128xf32>,
    %c1_i32_43 = arith.constant 1 : i32
    %94 = arith.cmpi slt, %83, %c1_i32_43 : i32
    %95 = arith.select %94, %91, %82 : vector<1x128xf32>
    %c7_i32 = arith.constant 7 : i32
    %96 = arith.addi %0, %c7_i32 : i32
    %97 = arith.index_cast %96 : i32 to index
    %98 = memref.load %arg1[%97] : memref<8xi32, #tpu.memory_space<smem>>
    %99 = arith.index_cast %98 : i32 to index
    %c0_44 = arith.constant 0 : index
    %100 = vector.load %arg2[%99, %c0_44] : memref<100x128xf32, #tpu.memory_space<vmem>>, vector<1x128xf32>
    %c0_45 = arith.constant 0 : index
    %c0_46 = arith.constant 0 : index
    %101 = vector.load %arg4[%c0_45, %c0_46] : memref<128x128xf32, #tpu.memory_space<vmem>>, vector<128x128xf32>
    %cst_47 = arith.constant dense<0.000000e+00> : vector<1x128xf32>
    %102 = tpu.matmul %95, %101, %cst_47 {dimension_numbers = #tpu.dot_dimension_numbers<[1], [0], [0], [1], [0, 0, 1, 1], [], []>} : vector<1x128xf32>, vector<128x128xf32>, vector<1x128xf32> -> vector<1x128xf32>
    %103 = arith.addf %100, %102 : vector<1x128xf32>
    %104 = math.tanh %103 : vector<1x128xf32>
    %105 = arith.index_cast %c7_i32 : i32 to index
    %c0_48 = arith.constant 0 : index
    %106 = vector.load %arg10[%105, %c0_48] : memref<8x128xf32, #tpu.memory_space<vmem>>, vector<1x128xf32>
    tpu.vector_store %arg10[%105, %c0_48], %104 {strides = array<i32>} : memref<8x128xf32, #tpu.memory_space<vmem>>, vector<1x128xf32>,
    %c1_i32_49 = arith.constant 1 : i32
    %107 = arith.cmpi slt, %96, %c1_i32_49 : i32
    %108 = arith.select %107, %104, %95 : vector<1x128xf32>
    %c8_i32_50 = arith.constant 8 : i32
    %c0_51 = arith.constant 0 : index
    %c0_52 = arith.constant 0 : index
    %109 = vector.load %arg9[%c0_51, %c0_52] : memref<1x128xf32, #tpu.memory_space<vmem>>, vector<1x128xf32>
    tpu.vector_store %arg9[%c0_51, %c0_52], %108 {strides = array<i32>} : memref<1x128xf32, #tpu.memory_space<vmem>>, vector<1x128xf32>,
    %c0_i32_53 = arith.constant 0 : i32
    %110 = arith.cmpi eq, %arg0, %c0_i32_53 : i32
    %111 = arith.extui %110 : i1 to i32
    %c0_i32_54 = arith.constant 0 : i32
    %112 = arith.cmpi ne, %111, %c0_i32_54 : i32
    scf.if %112 {
      %c0_64 = arith.constant 0 : index
      %c0_65 = arith.constant 0 : index
      %120 = vector.load %arg8[%c0_64, %c0_65] : memref<1x128xf32, #tpu.memory_space<vmem>>, vector<1x128xf32>
      tpu.vector_store %arg8[%c0_64, %c0_65], %108 {strides = array<i32>} : memref<1x128xf32, #tpu.memory_space<vmem>>, vector<1x128xf32>,
    } else {
    }
    %c0_55 = arith.constant 0 : index
    %c0_56 = arith.constant 0 : index
    %113 = vector.load %arg10[%c0_55, %c0_56] : memref<8x128xf32, #tpu.memory_space<vmem>>, vector<8x128xf32>
    %c0_57 = arith.constant 0 : index
    %c0_58 = arith.constant 0 : index
    %114 = vector.load %arg5[%c0_57, %c0_58] : memref<128x128xf32, #tpu.memory_space<vmem>>, vector<128x128xf32>
    %cst_59 = arith.constant dense<0.000000e+00> : vector<8x128xf32>
    %115 = tpu.matmul %113, %114, %cst_59 {dimension_numbers = #tpu.dot_dimension_numbers<[1], [0], [0], [1], [0, 0, 1, 1], [], []>} : vector<8x128xf32>, vector<128x128xf32>, vector<8x128xf32> -> vector<8x128xf32>
    %c0_60 = arith.constant 0 : index
    %c0_61 = arith.constant 0 : index
    %116 = vector.load %arg6[%c0_60, %c0_61] : memref<1x128xf32, #tpu.memory_space<vmem>>, vector<1x128xf32>
    %117 = vector.broadcast %116 : vector<1x128xf32> to vector<8x128xf32>
    %118 = arith.addf %115, %117 : vector<8x128xf32>
    %c0_62 = arith.constant 0 : index
    %c0_63 = arith.constant 0 : index
    %119 = vector.load %arg7[%c0_62, %c0_63] : memref<8x128xf32, #tpu.memory_space<vmem>>, vector<8x128xf32>
    tpu.vector_store %arg7[%c0_62, %c0_63], %118 {strides = array<i32>} : memref<8x128xf32, #tpu.memory_space<vmem>>, vector<8x128xf32>,
    return
  }
  func.func @transform_0(%arg0: i32, %arg1: memref<8xi32, #tpu.memory_space<smem>>) -> (i32, i32) {
    %c0_i32 = arith.constant 0 : i32
    %c0_i32_0 = arith.constant 0 : i32
    %c0_i32_1 = arith.constant 0 : i32
    return %c0_i32, %c0_i32_0 : i32, i32
  }
  func.func @transform_1(%arg0: i32, %arg1: memref<8xi32, #tpu.memory_space<smem>>) -> (i32, i32) {
    %c0_i32 = arith.constant 0 : i32
    %c0_i32_0 = arith.constant 0 : i32
    %c0_i32_1 = arith.constant 0 : i32
    return %c0_i32, %c0_i32_0 : i32, i32
  }
  func.func @transform_2(%arg0: i32, %arg1: memref<8xi32, #tpu.memory_space<smem>>) -> (i32, i32) {
    %c0_i32 = arith.constant 0 : i32
    %c0_i32_0 = arith.constant 0 : i32
    %c0_i32_1 = arith.constant 0 : i32
    return %c0_i32, %c0_i32_0 : i32, i32
  }
  func.func @transform_3(%arg0: i32, %arg1: memref<8xi32, #tpu.memory_space<smem>>) -> (i32, i32) {
    %c0_i32 = arith.constant 0 : i32
    %c0_i32_0 = arith.constant 0 : i32
    %c0_i32_1 = arith.constant 0 : i32
    return %c0_i32, %c0_i32_0 : i32, i32
  }
  func.func @transform_4(%arg0: i32, %arg1: memref<8xi32, #tpu.memory_space<smem>>) -> (i32, i32) {
    %c0_i32 = arith.constant 0 : i32
    %c0_i32_0 = arith.constant 0 : i32
    %c0_i32_1 = arith.constant 0 : i32
    return %c0_i32, %c0_i32_0 : i32, i32
  }
  func.func @transform_5(%arg0: i32, %arg1: memref<8xi32, #tpu.memory_space<smem>>) -> (i32, i32) {
    %c0_i32 = arith.constant 0 : i32
    %c0_i32_0 = arith.constant 0 : i32
    return %arg0, %c0_i32 : i32, i32
  }
  func.func @transform_6(%arg0: i32, %arg1: memref<8xi32, #tpu.memory_space<smem>>) -> (i32, i32) {
    %c0_i32 = arith.constant 0 : i32
    %c0_i32_0 = arith.constant 0 : i32
    %c0_i32_1 = arith.constant 0 : i32
    return %c0_i32, %c0_i32_0 : i32, i32
  }
}

</mosaic_0001>

<bundles_post_ra>
// kernel: tpu_custom_call.1
= control target key start
LH: loop header
LB: loop body
LE: loop exit
PB: predicated region body
PF: predicated region fallthrough
CT: control target
= control target key end

     0   :  { %s2175_s0 = inlined_call_operand.hbm [shape: s32[8], index: 0, kind: input, shape index: {}]   ;;  %s2176_s1 = inlined_call_operand.hbm [shape: f32[100,128], index: 1, kind: input, shape index: {}]   ;;  %s2177_s2 = inlined_call_operand.vmem [shape: f32[1,128], index: 2, kind: input, shape index: {}]   ;;  %s2178_s3 = inlined_call_operand.hbm [shape: f32[128,128], index: 3, kind: input, shape index: {}]   ;;  %s2179_s4 = inlined_call_operand.hbm [shape: f32[128,128], index: 4, kind: input, shape index: {}]   ;;  %s2180_s5 = inlined_call_operand.vmem [shape: f32[1,128], index: 5, kind: input, shape index: {}]   ;;  %s2181_s6 = inlined_call_operand.hbm [shape: f32[8,128], index: 6, kind: output, shape index: {0}]   ;;  %s2182_s7 = inlined_call_operand.hbm [shape: f32[1,128], index: 7, kind: output, shape index: {1}]  }
   0x1   :  { %s1718_s26 = scalar_lea.hbm %s2175_s0, 16 }
   0x2   :  { %p1719_p0 = scmp.ne.s32.totalorder %s2175_s0, %s1718_s26  ;;  %p1722_p1 = scmp.lt.u32.totalorder %s1718_s26, %s2175_s0 }
   0x4   :  { %p1724_p2 = pnand %p1722_p1, %p1719_p0 }
   0x6   :  { %1727 = shalt.err (!%p1724_p2)  }
   0x7   :  { %s1848_s8 = smov [#allocation5]  }
   0x8   :  { %14 = dma.hbm_to_smem %s2175_s0, 16, %s1848_s8, [#allocation4] }
   0x9   :  { %1838 = dma.done.wait [#allocation4], 16 }
   0xa   :  { %1839 = vsyncadd [#allocation4], 4294967280 }
   0xb   :  { %16 = sfence }
   0xc   :  { %17 = vsyncpa [#allocation7], 0 }
   0xd   :  { %18 = vsyncpa [#allocation10], 0 }
   0xe   :  { %19 = vsyncpa [#allocation8], 0 }
   0xf   :  { %20 = vsyncpa [#allocation14], 0  ;;  %s1849_s11 = smov [#allocation9]   ;;  %s1850_s13 = smov [#allocation6]  }
  0x10   :  { %s40_s12 = sshll.u32 %s1849_s11, 4  ;;  %s26_s14 = sshll.u32 %s1850_s13, 4  ;;  %s41_s12 = int_to_ptr.vmem [resolvable:$true] %s40_s12  ;;  %s1911_s14 = int_to_ptr.vmem [resolvable:$true] %s26_s14 }
  0x11   :  { %s1728_s17 = scalar_lea.hbm %s2178_s3, 2048 }
  0x12   :  { %p1729_p3 = scmp.ne.s32.totalorder %s2178_s3, %s1728_s17  ;;  %p1732_p4 = scmp.lt.u32.totalorder %s1728_s17, %s2178_s3 }
  0x14   :  { %p1734_p5 = pnand %p1732_p4, %p1729_p3 }
  0x16   :  { %1737 = shalt.err (!%p1734_p5)
}
  0x17   :  { %s1738_s21 = scalar_lea.vmem %s41_s12, 2048  ;;  %p1743_p7 = scmp.lt.s32.totalorder %s41_s12, %s41_s12 }
  0x18   :  { %p1739_p6 = scmp.ne.s32.totalorder %s41_s12, %s1738_s21  ;;  %p1744_p8 = scmp.lt.s32.totalorder %s1738_s21, %s1738_s21 }
  0x1a   :  { %p1745_p9 = por %p1744_p8, %p1743_p7 }
  0x1c   :  { %p1746_p10 = pnand %p1745_p9, %p1739_p6 }
  0x1e   :  { %1749 = shalt.err (!%p1746_p10)
}
  0x1f   :  { %s1851_s22 = smov 128   ;;  %s1852_s23 = smov 8  }
  0x20   :  { %46 = dma.hbm_to_vmem [thread:$0]  %s2178_s3, 2048, %s41_s12, [#allocation10], %s1851_s22, %s1851_s22, %s1852_s23  }
  0x21   :  { %s1750_s28 = scalar_lea.hbm %s2176_s1, 1664 }
  0x22   :  { %p1751_p11 = scmp.ne.s32.totalorder %s2176_s1, %s1750_s28  ;;  %p1754_p12 = scmp.lt.u32.totalorder %s1750_s28, %s2176_s1 }
  0x24   :  { %p1756_p13 = pnand %p1754_p12, %p1751_p11 }
  0x26   :  { %1759 = shalt.err (!%p1756_p13)
}
  0x27   :  { %s1760_s10 = scalar_lea.vmem %s1911_s14, 1664  ;;  %p1765_p1 = scmp.lt.s32.totalorder %s1911_s14, %s1911_s14 }
  0x28   :  { %p1761_p0 = scmp.ne.s32.totalorder %s1911_s14, %s1760_s10  ;;  %p1766_p2 = scmp.lt.s32.totalorder %s1760_s10, %s1760_s10 }
  0x2a   :  { %p1767_p3 = por %p1766_p2, %p1765_p1 }
  0x2c   :  { %p1768_p4 = pnand %p1767_p3, %p1761_p0 }
  0x2e   :  { %1771 = shalt.err (!%p1768_p4)
}
  0x2f   :  { %32 = dma.hbm_to_vmem [thread:$0]  %s2176_s1, 1664, %s1911_s14, [#allocation7], %s1851_s22, %s1851_s22, %s1852_s23  }
  0x30   :  { %s1853_s12 = smov [#allocation11]   ;;  %s1772_s17 = scalar_lea.hbm %s2179_s4, 2048 }
  0x31   :  { %s52_s13 = sshll.u32 %s1853_s12, 4  ;;  %p1773_p5 = scmp.ne.s32.totalorder %s2179_s4, %s1772_s17  ;;  %s53_s13 = int_to_ptr.vmem [resolvable:$true] %s52_s13 }
  0x32   :  { %p1776_p6 = scmp.lt.u32.totalorder %s1772_s17, %s2179_s4 }
  0x34   :  { %p1778_p7 = pnand %p1776_p6, %p1773_p5 }
  0x36   :  { %1781 = shalt.err (!%p1778_p7)
}
  0x37   :  { %s1782_s21 = scalar_lea.vmem %s53_s13, 2048  ;;  %p1787_p9 = scmp.lt.s32.totalorder %s53_s13, %s53_s13 }
  0x38   :  { %p1783_p8 = scmp.ne.s32.totalorder %s53_s13, %s1782_s21  ;;  %p1788_p10 = scmp.lt.s32.totalorder %s1782_s21, %s1782_s21 }
  0x3a   :  { %p1789_p11 = por %p1788_p10, %p1787_p9 }
  0x3c   :  { %p1790_p12 = pnand %p1789_p11, %p1783_p8 }
  0x3e   :  { %1793 = shalt.err (!%p1790_p12)
}
  0x3f   :  { %58 = dma.hbm_to_vmem [thread:$0]  %s2179_s4, 2048, %s53_s13, [#allocation10], %s1851_s22, %s1851_s22, %s1852_s23  }
  0x40   :  { %1840 = dma.done.wait [#allocation7], 1664  }
  0x41   :  { %1841 = vsyncadd [#allocation7], 4294965632 }
  0x42   :  { %1842 = dma.done.wait [#allocation10], 4096  }
  0x43   :  { %1843 = vsyncadd [#allocation10], 4294963200  ;;  %v1854_v0 = vmov 0.0|0.0   ;;  %vm1855_vm0 = vmmov 0   ;;  %v1856_v1 = vmov 0.0   ;;  %v81_v2 = vld [vmem:[#allocation9] sm:$0xff] }
  0x44   :  { %1475 = vmatprep.subr.bf16.mxu0 %v1854_v0  ;;  %1192 = vmatprep.mubr.msk.f32.mxu0 %vm1855_vm0, %v1856_v1  ;;  %v82_v3 = vld [vmem:[#allocation9 + $0x8] sm:$0xff]  ;;  %v83_v4 = vld [vmem:[#allocation9 + $0x10] sm:$0xff]  ;;  %v84_v6 = vld [vmem:[#allocation9 + $0x18] sm:$0xff]  ;;  %s999_s24 = sld [smem:[#allocation5 + $0x1]]  ;;  %s1000_s25 = sld [smem:[#allocation5 + $0x2]] }
  0x45   :  { %1499 = vmatprep.subr.bf16.mxu1 %v1854_v0  ;;  %1227 = vmatprep.mubr.msk.f32.mxu1 %vm1855_vm0, %v1856_v1  ;;  %v1969_v5 = vpack.c.bf16 %v82_v3, %v81_v2  ;;  %v1972_v7 = vpack.c.bf16 %v84_v6, %v83_v4  ;;  %v85_v8 = vld [vmem:[#allocation9 + $0x20] sm:$0xff]  ;;  %v86_v9 = vld [vmem:[#allocation9 + $0x28] sm:$0xff]  ;;  %v87_v12 = vld [vmem:[#allocation9 + $0x30] sm:$0xff]  ;;  %s1001_s28 = sld [smem:[#allocation5 + $0x3]]  ;;  %s1002_s29 = sld [smem:[#allocation5 + $0x4]] }
  0x46   :  { %v75_v10 = vld [vmem:[%s2177_s2] sm:$0x1]  ;;  %v1981_v11 = vpack.c.bf16 %v86_v9, %v85_v8  ;;  %v88_v13 = vld [vmem:[#allocation9 + $0x38] sm:$0xff]  ;;  %v89_v15 = vld [vmem:[#allocation9 + $0x40] sm:$0xff]  ;;  %s78_s2 = sld [smem:[#allocation5]]  ;;  %s1003_s9 = sld [smem:[#allocation5 + $0x5]] }
  0x47   :  { %1477 = vmatpush3.bf16.msra.mxu0 %v1969_v5  ;;  %1501 = vmatpush3.bf16.msra.mxu1 %v1969_v5  ;;  %76 = vst [vmem:[#allocation2] sm:$0x1] %v75_v10  ;;  %v1987_v14 = vpack.c.bf16 %v88_v13, %v87_v12  ;;  %v90_v16 = vld [vmem:[#allocation9 + $0x48] sm:$0xff]  ;;  %v91_v18 = vld [vmem:[#allocation9 + $0x50] sm:$0xff]  ;;  %v92_v19 = vld [vmem:[#allocation9 + $0x58] sm:$0xff]  ;;  %s1004_s10 = sld [smem:[#allocation5 + $0x6]] }
  0x48   :  { %1478 = vmatprep.subr.bf16.mxu0 %v1854_v0  ;;  %1502 = vmatprep.subr.bf16.mxu1 %v1854_v0  ;;  %v1993_v17 = vpack.c.bf16 %v90_v16, %v89_v15  ;;  %v1999_v20 = vpack.c.bf16 %v92_v19, %v91_v18  ;;  %v93_v21 = vld [vmem:[#allocation9 + $0x60] sm:$0xff]  ;;  %v94_v22 = vld [vmem:[#allocation9 + $0x68] sm:$0xff]  ;;  %v95_v24 = vld [vmem:[#allocation9 + $0x70] sm:$0xff]  ;;  %s1005_s12 = sld [smem:[#allocation5 + $0x7]]  ;;  %s1857_s15 = smov [#allocation13]  }
  0x49   :  { %v2005_v23 = vpack.c.bf16 %v94_v22, %v93_v21  ;;  %v96_v25 = vld [vmem:[#allocation9 + $0x78] sm:$0xff]  ;;  %v867_v33 = vld [vmem:[#allocation11] sm:$0xff]  ;;  %v868_v34 = vld [vmem:[#allocation11 + $0x8] sm:$0xff]  ;;  %s977_s16 = sshll.u32 %s1857_s15, 4  ;;  %s978_s16 = int_to_ptr.vmem [resolvable:$true] %s977_s16 }
  0x4a   :  { %v2011_v26 = vpack.c.bf16 %v96_v25, %v95_v24  ;;  %v869_v35 = vld [vmem:[#allocation11 + $0x10] sm:$0xff]  ;;  %v1668_v36 = vpack.c.bf16 %v868_v34, %v867_v33  ;;  %v870_v37 = vld [vmem:[#allocation11 + $0x18] sm:$0xff]  ;;  %v871_v39 = vld [vmem:[#allocation11 + $0x20] sm:$0xff]  ;;  %s177_s26 = scalar_lea.vmem [#allocation6], %s999_s24  ;;  %s275_s27 = scalar_lea.vmem [#allocation6], %s1000_s25 }
  0x4b   :  { %1480 = vmatpush3.bf16.msra.mxu0 %v1972_v7  ;;  %1504 = vmatpush3.bf16.msra.mxu1 %v1972_v7  ;;  %v1671_v38 = vpack.c.bf16 %v870_v37, %v869_v35  ;;  %v872_v40 = vld [vmem:[#allocation11 + $0x28] sm:$0xff]  ;;  %v873_v42 = vld [vmem:[#allocation11 + $0x30] sm:$0xff]  ;;  %v874_v43 = vld [vmem:[#allocation11 + $0x38] sm:$0xff]  ;;  %s373_s30 = scalar_lea.vmem [#allocation6], %s1001_s28  ;;  %s471_s8 = scalar_lea.vmem [#allocation6], %s1002_s29 }
  0x4c   :  { %1481 = vmatprep.subr.bf16.mxu0 %v1854_v0  ;;  %1505 = vmatprep.subr.bf16.mxu1 %v1854_v0  ;;  %s79_s23 = scalar_lea.vmem [#allocation6], %s78_s2  ;;  %v1674_v41 = vpack.c.bf16 %v872_v40, %v871_v39  ;;  %v1677_v44 = vpack.c.bf16 %v874_v43, %v873_v42  ;;  %v875_v45 = vld [vmem:[#allocation11 + $0x40] sm:$0xff]  ;;  %v876_v46 = vld [vmem:[#allocation11 + $0x48] sm:$0xff]  ;;  %v877_v48 = vld [vmem:[#allocation11 + $0x50] sm:$0xff]  ;;  %s569_s3 = scalar_lea.vmem [#allocation6], %s1003_s9 }
  0x4d   :  { %v80_v28 = vld [vmem:[%s79_s23] sm:$0x1]  ;;  %v1680_v47 = vpack.c.bf16 %v876_v46, %v875_v45  ;;  %v878_v49 = vld [vmem:[#allocation11 + $0x58] sm:$0xff]  ;;  %v879_v51 = vld [vmem:[#allocation11 + $0x60] sm:$0xff]  ;;  %s667_s11 = scalar_lea.vmem [#allocation6], %s1004_s10  ;;  %s1794_s17 = scalar_lea.vmem %s978_s16, 16 }
  0x4e   :  { %v77_v27 = vld [vmem:[#allocation2] sm:$0x1]  ;;  %v1683_v50 = vpack.c.bf16 %v878_v49, %v877_v48  ;;  %v881_v54 = vld [vmem:[#allocation11 + $0x70] sm:$0xff]  ;;  %v882_v55 = vld [vmem:[#allocation11 + $0x78] sm:$0xff]  ;;  %s765_s13 = scalar_lea.vmem [#allocation6], %s1005_s12  ;;  %p1795_p13 = scmp.ne.s32.totalorder %s978_s16, %s1794_s17 }
  0x4f   :  { %1483 = vmatpush3.bf16.msra.mxu0 %v1981_v11  ;;  %1507 = vmatpush3.bf16.msra.mxu1 %v1981_v11  ;;  %v880_v52 = vld [vmem:[#allocation11 + $0x68] sm:$0xff]  ;;  %v1689_v56 = vpack.c.bf16 %v882_v55, %v881_v54  ;;  %s1798_s18 = scalar_lea.vmem %s978_s16, 32  ;;  %p1799_p0 = scmp.lt.s32.totalorder %s978_s16, %s978_s16 }
  0x50   :  { %1484 = vmatprep.subr.bf16.mxu0 %v1854_v0  ;;  %1508 = vmatprep.subr.bf16.mxu1 %v1854_v0  ;;  %v1686_v53 = vpack.c.bf16 %v880_v52, %v879_v51  ;;  %v178_v57 = vld [vmem:[%s177_s26] sm:$0x1]  ;;  %p1800_p1 = scmp.lt.s32.totalorder %s1798_s18, %s1794_s17 }
  0x51   :  { %v276_v58 = vld [vmem:[%s275_s27] sm:$0x1] }
  0x52   :  { %v472_v4 = vld [vmem:[%s471_s8] sm:$0x1]  ;;  %p1801_p2 = por %p1800_p1, %p1799_p0 }
  0x53   :  { %1486 = vmatpush3.bf16.msra.mxu0 %v1987_v14  ;;  %1510 = vmatpush3.bf16.msra.mxu1 %v1987_v14  ;;  %v570_v13 = vld [vmem:[%s569_s3] sm:$0x1] }
  0x54   :  { %1487 = vmatprep.subr.bf16.mxu0 %v1854_v0  ;;  %1511 = vmatprep.subr.bf16.mxu1 %v1854_v0  ;;  %p1802_p3 = pnand %p1801_p2, %p1795_p13 }
  0x57   :  { %1489 = vmatpush3.bf16.msra.mxu0 %v1993_v17  ;;  %1513 = vmatpush3.bf16.msra.mxu1 %v1993_v17 }
  0x58   :  { %1490 = vmatprep.subr.bf16.mxu0 %v1854_v0  ;;  %1514 = vmatprep.subr.bf16.mxu1 %v1854_v0 }
  0x5b   :  { %1492 = vmatpush3.bf16.msra.mxu0 %v1999_v20  ;;  %1516 = vmatpush3.bf16.msra.mxu1 %v1999_v20 }
  0x5c   :  { %1493 = vmatprep.subr.bf16.mxu0 %v1854_v0  ;;  %1517 = vmatprep.subr.bf16.mxu1 %v1854_v0 }
  0x5f   :  { %1495 = vmatpush3.bf16.msra.mxu0 %v2005_v23  ;;  %1519 = vmatpush3.bf16.msra.mxu1 %v2005_v23 }
  0x60   :  { %1496 = vmatprep.subr.bf16.mxu0 %v1854_v0  ;;  %1520 = vmatprep.subr.bf16.mxu1 %v1854_v0 }
  0x63   :  { %1498 = vmatpush3.bf16.msra.mxu0 %v2011_v26  ;;  %1522 = vmatpush3.bf16.msra.mxu1 %v2011_v26 }
  0x64   :  { %1523 = vmatprep.subr.bf16.mxu0 %v1854_v0  ;;  %1547 = vmatprep.subr.bf16.mxu1 %v1854_v0 }
  0x66   :  { %1193 = vmatmul.mubr.f32.vlgmr.msra.gmra.mrb[0].mxu0 %v77_v27 }
  0x67   :  { %1525 = vmatpush3.bf16.msra.mxu0 %v1969_v5  ;;  %1262 = vmatprep.mubr.msk.f32.mxu0 %vm1855_vm0, %v1856_v1 }
  0x68   :  { %1526 = vmatprep.subr.bf16.mxu0 %v1854_v0 }
  0x6b   :  { %1528 = vmatpush3.bf16.msra.mxu0 %v1972_v7 }
  0x6c   :  { %1529 = vmatprep.subr.bf16.mxu0 %v1854_v0 }
  0x6f   :  { %1531 = vmatpush3.bf16.msra.mxu0 %v1981_v11 }
  0x70   :  { %1532 = vmatprep.subr.bf16.mxu0 %v1854_v0 }
  0x73   :  { %1534 = vmatpush3.bf16.msra.mxu0 %v1987_v14 }
  0x74   :  { %1535 = vmatprep.subr.bf16.mxu0 %v1854_v0 }
  0x77   :  { %1537 = vmatpush3.bf16.msra.mxu0 %v1993_v17 }
  0x78   :  { %1538 = vmatprep.subr.bf16.mxu0 %v1854_v0 }
  0x7b   :  { %1540 = vmatpush3.bf16.msra.mxu0 %v1999_v20 }
  0x7c   :  { %1541 = vmatprep.subr.bf16.mxu0 %v1854_v0 }
  0x7f   :  { %1543 = vmatpush3.bf16.msra.mxu0 %v2005_v23 }
  0x80   :  { %1544 = vmatprep.subr.bf16.mxu0 %v1854_v0 }
  0x83   :  { %1546 = vmatpush3.bf16.msra.mxu0 %v2011_v26 }
  0x84   :  { %1571 = vmatprep.subr.bf16.mxu0 %v1854_v0 }
 0x139   :  { %v163_v29 = vpop.f32.mrb[0].mxu0 }
 0x13a   :  { %v167_v30 = vadd.f32 %v163_v29, %v80_v28  ;;  %v1194_v31 = vpop.f32.mrb[1].mxu0 }
 0x13c   :  { %1702 = vtanh.f32 %v167_v30 }
 0x146   :  { %v2038_v32 = vpop.eup %1702 }
 0x147   :  { %861 = vst [vmem:[#allocation2] sm:$0x1] %v2038_v32  ;;  %169 = vst [vmem:[#allocation3] sm:$0x1] %v2038_v32  ;;  %1228 = vmatmul.mubr.f32.vlgmr.msra.gmra.mrb[0].mxu1 %v2038_v32  ;;  %1263 = vmatmul.mubr.f32.vlgmr.msra.gmra.mrb[2].mxu0 %v2038_v32 }
 0x148   :  { %865 = vst [vmem:[#allocation13] sm:$0x1] %v2038_v32  ;;  %1549 = vmatpush3.bf16.msra.mxu1 %v1969_v5  ;;  %1573 = vmatpush3.bf16.msra.mxu0 %v1969_v5 }
 0x149   :  { %1550 = vmatprep.subr.bf16.mxu1 %v1854_v0  ;;  %1574 = vmatprep.subr.bf16.mxu0 %v1854_v0 }
 0x14a   :  { %1297 = vmatprep.mubr.msk.f32.mxu1 %vm1855_vm0, %v1856_v1  ;;  %1332 = vmatprep.mubr.msk.f32.mxu0 %vm1855_vm0, %v1856_v1 }
 0x14c   :  { %1552 = vmatpush3.bf16.msra.mxu1 %v1972_v7  ;;  %1576 = vmatpush3.bf16.msra.mxu0 %v1972_v7 }
 0x14d   :  { %1553 = vmatprep.subr.bf16.mxu1 %v1854_v0  ;;  %1577 = vmatprep.subr.bf16.mxu0 %v1854_v0 }
 0x150   :  { %1555 = vmatpush3.bf16.msra.mxu1 %v1981_v11  ;;  %1579 = vmatpush3.bf16.msra.mxu0 %v1981_v11 }
 0x151   :  { %1556 = vmatprep.subr.bf16.mxu1 %v1854_v0  ;;  %1580 = vmatprep.subr.bf16.mxu0 %v1854_v0 }
 0x154   :  { %1558 = vmatpush3.bf16.msra.mxu1 %v1987_v14  ;;  %1582 = vmatpush3.bf16.msra.mxu0 %v1987_v14 }
 0x155   :  { %1559 = vmatprep.subr.bf16.mxu1 %v1854_v0  ;;  %1583 = vmatprep.subr.bf16.mxu0 %v1854_v0 }
 0x158   :  { %1561 = vmatpush3.bf16.msra.mxu1 %v1993_v17  ;;  %1585 = vmatpush3.bf16.msra.mxu0 %v1993_v17 }
 0x159   :  { %1562 = vmatprep.subr.bf16.mxu1 %v1854_v0  ;;  %1586 = vmatprep.subr.bf16.mxu0 %v1854_v0 }
 0x15c   :  { %1564 = vmatpush3.bf16.msra.mxu1 %v1999_v20  ;;  %1588 = vmatpush3.bf16.msra.mxu0 %v1999_v20 }
 0x15d   :  { %1565 = vmatprep.subr.bf16.mxu1 %v1854_v0  ;;  %1589 = vmatprep.subr.bf16.mxu0 %v1854_v0 }
 0x160   :  { %1567 = vmatpush3.bf16.msra.mxu1 %v2005_v23  ;;  %1591 = vmatpush3.bf16.msra.mxu0 %v2005_v23 }
 0x161   :  { %1568 = vmatprep.subr.bf16.mxu1 %v1854_v0  ;;  %1592 = vmatprep.subr.bf16.mxu0 %v1854_v0 }
 0x164   :  { %1570 = vmatpush3.bf16.msra.mxu1 %v2011_v26  ;;  %1594 = vmatpush3.bf16.msra.mxu0 %v2011_v26 }
 0x165   :  { %1595 = vmatprep.subr.bf16.mxu1 %v1854_v0  ;;  %1619 = vmatprep.subr.bf16.mxu0 %v1854_v0 }
 0x167   :  { %1298 = vmatmul.mubr.f32.vlgmr.msra.gmra.mrb[2].mxu1 %v2038_v32  ;;  %1333 = vmatmul.mubr.f32.vlgmr.msra.gmra.mrb[4].mxu0 %v2038_v32 }
 0x168   :  { %1597 = vmatpush3.bf16.msra.mxu1 %v1969_v5  ;;  %1621 = vmatpush3.bf16.msra.mxu0 %v1969_v5 }
 0x169   :  { %1598 = vmatprep.subr.bf16.mxu1 %v1854_v0  ;;  %1622 = vmatprep.subr.bf16.mxu0 %v1854_v0 }
 0x16a   :  { %1367 = vmatprep.mubr.msk.f32.mxu1 %vm1855_vm0, %v1856_v1  ;;  %1402 = vmatprep.mubr.msk.f32.mxu0 %vm1855_vm0, %v1856_v1 }
 0x16c   :  { %1600 = vmatpush3.bf16.msra.mxu1 %v1972_v7  ;;  %1624 = vmatpush3.bf16.msra.mxu0 %v1972_v7 }
 0x16d   :  { %1601 = vmatprep.subr.bf16.mxu1 %v1854_v0  ;;  %1625 = vmatprep.subr.bf16.mxu0 %v1854_v0 }
 0x170   :  { %1603 = vmatpush3.bf16.msra.mxu1 %v1981_v11  ;;  %1627 = vmatpush3.bf16.msra.mxu0 %v1981_v11 }
 0x171   :  { %1604 = vmatprep.subr.bf16.mxu1 %v1854_v0  ;;  %1628 = vmatprep.subr.bf16.mxu0 %v1854_v0 }
 0x174   :  { %1606 = vmatpush3.bf16.msra.mxu1 %v1987_v14  ;;  %1630 = vmatpush3.bf16.msra.mxu0 %v1987_v14 }
 0x175   :  { %1607 = vmatprep.subr.bf16.mxu1 %v1854_v0  ;;  %1631 = vmatprep.subr.bf16.mxu0 %v1854_v0 }
 0x178   :  { %1609 = vmatpush3.bf16.msra.mxu1 %v1993_v17  ;;  %1633 = vmatpush3.bf16.msra.mxu0 %v1993_v17 }
 0x179   :  { %1610 = vmatprep.subr.bf16.mxu1 %v1854_v0  ;;  %1634 = vmatprep.subr.bf16.mxu0 %v1854_v0 }
 0x17c   :  { %1612 = vmatpush3.bf16.msra.mxu1 %v1999_v20  ;;  %1636 = vmatpush3.bf16.msra.mxu0 %v1999_v20 }
 0x17d   :  { %1613 = vmatprep.subr.bf16.mxu1 %v1854_v0  ;;  %1637 = vmatprep.subr.bf16.mxu0 %v1854_v0 }
 0x180   :  { %1615 = vmatpush3.bf16.msra.mxu1 %v2005_v23  ;;  %1639 = vmatpush3.bf16.msra.mxu0 %v2005_v23 }
 0x181   :  { %1616 = vmatprep.subr.bf16.mxu1 %v1854_v0  ;;  %1640 = vmatprep.subr.bf16.mxu0 %v1854_v0 }
 0x184   :  { %1618 = vmatpush3.bf16.msra.mxu1 %v2011_v26  ;;  %1642 = vmatpush3.bf16.msra.mxu0 %v2011_v26 }
 0x185   :  { %1643 = vmatprep.subr.bf16.mxu1 %v1854_v0  ;;  %1667 = vmatprep.subr.bf16.mxu0 %v1854_v0 }
 0x187   :  { %1368 = vmatmul.mubr.f32.vlgmr.msra.gmra.mrb[4].mxu1 %v2038_v32  ;;  %1403 = vmatmul.mubr.f32.vlgmr.msra.gmra.mrb[6].mxu0 %v2038_v32 }
 0x188   :  { %1645 = vmatpush3.bf16.msra.mxu1 %v1969_v5  ;;  %1437 = vmatprep.mubr.msk.f32.mxu1 %vm1855_vm0, %v1856_v1 }
 0x189   :  { %1646 = vmatprep.subr.bf16.mxu1 %v1854_v0  ;;  %1472 = vmatprep.mubr.msk.f32.mxu0 %vm1855_vm0, %v1856_v1 }
 0x18a   :  { %1669 = vmatpush3.bf16.msra.mxu0 %v1668_v36 }
 0x18b   :  { %1670 = vmatprep.subr.bf16.mxu0 %v1854_v0 }
 0x18c   :  { %1648 = vmatpush3.bf16.msra.mxu1 %v1972_v7 }
 0x18d   :  { %1649 = vmatprep.subr.bf16.mxu1 %v1854_v0 }
 0x18e   :  { %1672 = vmatpush3.bf16.msra.mxu0 %v1671_v38 }
 0x18f   :  { %1673 = vmatprep.subr.bf16.mxu0 %v1854_v0 }
 0x190   :  { %1651 = vmatpush3.bf16.msra.mxu1 %v1981_v11 }
 0x191   :  { %1652 = vmatprep.subr.bf16.mxu1 %v1854_v0 }
 0x192   :  { %1675 = vmatpush3.bf16.msra.mxu0 %v1674_v41 }
 0x193   :  { %1676 = vmatprep.subr.bf16.mxu0 %v1854_v0 }
 0x194   :  { %1654 = vmatpush3.bf16.msra.mxu1 %v1987_v14  ;;  %v668_v14 = vld [vmem:[%s667_s11] sm:$0x1] }
 0x195   :  { %1655 = vmatprep.subr.bf16.mxu1 %v1854_v0 }
 0x196   :  { %1678 = vmatpush3.bf16.msra.mxu0 %v1677_v44 }
 0x197   :  { %1679 = vmatprep.subr.bf16.mxu0 %v1854_v0 }
 0x198   :  { %1657 = vmatpush3.bf16.msra.mxu1 %v1993_v17 }
 0x199   :  { %1658 = vmatprep.subr.bf16.mxu1 %v1854_v0 }
 0x19a   :  { %1681 = vmatpush3.bf16.msra.mxu0 %v1680_v47 }
 0x19b   :  { %1682 = vmatprep.subr.bf16.mxu0 %v1854_v0 }
 0x19c   :  { %1660 = vmatpush3.bf16.msra.mxu1 %v1999_v20 }
 0x19d   :  { %1661 = vmatprep.subr.bf16.mxu1 %v1854_v0 }
 0x19e   :  { %1684 = vmatpush3.bf16.msra.mxu0 %v1683_v50 }
 0x19f   :  { %1685 = vmatprep.subr.bf16.mxu0 %v1854_v0 }
 0x1a0   :  { %1663 = vmatpush3.bf16.msra.mxu1 %v2005_v23  ;;  %v766_v23 = vld [vmem:[%s765_s13] sm:$0x1] }
 0x1a1   :  { %1664 = vmatprep.subr.bf16.mxu1 %v1854_v0 }
 0x1a2   :  { %1687 = vmatpush3.bf16.msra.mxu0 %v1686_v53 }
 0x1a3   :  { %1688 = vmatprep.subr.bf16.mxu0 %v1854_v0  ;;  %v374_v0 = vld [vmem:[%s373_s30] sm:$0x1] }
 0x1a4   :  { %1666 = vmatpush3.bf16.msra.mxu1 %v2011_v26 }
 0x1a6   :  { %1690 = vmatpush3.bf16.msra.mxu0 %v1689_v56 }
 0x1a7   :  { %1438 = vmatmul.mubr.f32.vlgmr.msra.gmra.mrb[6].mxu1 %v2038_v32 }
 0x21a   :  { %v261_v59 = vpop.f32.mrb[0].mxu1  ;;  %v359_v60 = vpop.f32.mrb[2].mxu0 }
 0x21b   :  { %v265_v61 = vadd.f32 %v261_v59, %v178_v57  ;;  %v363_v62 = vadd.f32 %v359_v60, %v276_v58  ;;  %v1229_v63 = vpop.f32.mrb[1].mxu1  ;;  %v1264_v1 = vpop.f32.mrb[3].mxu0 }
 0x21d   :  { %1704 = vtanh.f32 %v265_v61 }
 0x21e   :  { %1706 = vtanh.f32 %v363_v62 }
 0x227   :  { %v1705_v2 = vpop.eup %1704 }
 0x228   :  { %v1707_v3 = vpop.eup %1706  ;;  %267 = vst [vmem:[#allocation3 + $0x1] sm:$0x1] %v1705_v2 }
 0x229   :  { %365 = vst [vmem:[#allocation3 + $0x2] sm:$0x1] %v1707_v3 }
 0x23a   :  { %v457_v5 = vpop.f32.mrb[2].mxu1  ;;  %v555_v6 = vpop.f32.mrb[4].mxu0 }
 0x23b   :  { %v461_v7 = vadd.f32 %v457_v5, %v374_v0  ;;  %v559_v8 = vadd.f32 %v555_v6, %v472_v4  ;;  %v1299_v9 = vpop.f32.mrb[3].mxu1  ;;  %v1334_v10 = vpop.f32.mrb[5].mxu0 }
 0x23d   :  { %1708 = vtanh.f32 %v461_v7 }
 0x23e   :  { %1710 = vtanh.f32 %v559_v8 }
 0x247   :  { %v1709_v11 = vpop.eup %1708 }
 0x248   :  { %v1711_v12 = vpop.eup %1710  ;;  %463 = vst [vmem:[#allocation3 + $0x3] sm:$0x1] %v1709_v11 }
 0x249   :  { %561 = vst [vmem:[#allocation3 + $0x4] sm:$0x1] %v1711_v12 }
 0x25a   :  { %v653_v15 = vpop.f32.mrb[4].mxu1  ;;  %v751_v16 = vpop.f32.mrb[6].mxu0 }
 0x25b   :  { %v657_v17 = vadd.f32 %v653_v15, %v570_v13  ;;  %v755_v18 = vadd.f32 %v751_v16, %v668_v14  ;;  %v1369_v19 = vpop.f32.mrb[5].mxu1  ;;  %v1404_v20 = vpop.f32.mrb[7].mxu0 }
 0x25d   :  { %1712 = vtanh.f32 %v657_v17 }
 0x25e   :  { %1714 = vtanh.f32 %v755_v18 }
 0x267   :  { %v1713_v21 = vpop.eup %1712 }
 0x268   :  { %v1715_v22 = vpop.eup %1714  ;;  %659 = vst [vmem:[#allocation3 + $0x5] sm:$0x1] %v1713_v21 }
 0x269   :  { %757 = vst [vmem:[#allocation3 + $0x6] sm:$0x1] %v1715_v22 }
 0x27a   :  { %v849_v24 = vpop.f32.mrb[6].mxu1 }
 0x27b   :  { %v853_v25 = vadd.f32 %v849_v24, %v766_v23  ;;  %v1439_v26 = vpop.f32.mrb[7].mxu1 }
 0x27d   :  { %1716 = vtanh.f32 %v853_v25 }
 0x287   :  { %v1717_v27 = vpop.eup %1716 }
 0x288   :  { %855 = vst [vmem:[#allocation3 + $0x7] sm:$0x1] %v1717_v27 }
 0x28f   :  { %v866_v28 = vld [vmem:[#allocation3] sm:$0xff] }
 0x290   :  { %1473 = vmatmul.mubr.f32.vlgmr.msra.gmra.mrb[8].mxu0 %v866_v28 }
 0x291   :  { %1805 = shalt.err (!%p1802_p3)
}
 0x292   :  { %s1806_s20 = scalar_lea.hbm %s2182_s7, 16 }
 0x293   :  { %p1807_p4 = scmp.ne.s32.totalorder %s2182_s7, %s1806_s20  ;;  %p1810_p5 = scmp.lt.u32.totalorder %s1806_s20, %s2182_s7 }
 0x295   :  { %p1812_p6 = pnand %p1810_p5, %p1807_p4 }
 0x297   :  { %1815 = shalt.err (!%p1812_p6)
}
 0x298   :  { %980 = dma.vmem_to_hbm [thread:$0]  %s978_s16, 16, %s2182_s7, [#allocation14]   ;;  %v1006_v29 = vld [vmem:[%s2180_s5] ss:$0 sm:$0xff] }
 0x299   :  { %s1858_s25 = smov [#allocation12]  }
 0x29a   :  { %s967_s26 = sshll.u32 %s1858_s25, 4  ;;  %s968_s26 = int_to_ptr.vmem [resolvable:$true] %s967_s26 }
 0x29b   :  { %s1816_s27 = scalar_lea.vmem %s968_s26, 128  ;;  %p1821_p8 = scmp.lt.s32.totalorder %s968_s26, %s968_s26 }
 0x29c   :  { %p1817_p7 = scmp.ne.s32.totalorder %s968_s26, %s1816_s27  ;;  %p1822_p9 = scmp.lt.s32.totalorder %s1816_s27, %s1816_s27 }
 0x29e   :  { %p1823_p10 = por %p1822_p9, %p1821_p8 }
 0x2a0   :  { %p1824_p11 = pnand %p1823_p10, %p1817_p7 }
 0x363   :  { %v956_v30 = vpop.f32.mrb[8].mxu0 }
 0x364   :  { %v957_v31 = vadd.f32 %v1006_v29, %v956_v30  ;;  %v1474_v32 = vpop.f32.mrb[9].mxu0 }
 0x366   :  { %960 = vst [vmem:[#allocation12] sm:$0xff] %v957_v31 }
 0x367   :  { %1827 = shalt.err (!%p1824_p11)
}
 0x368   :  { %s1828_s29 = scalar_lea.hbm %s2181_s6, 128 }
 0x369   :  { %p1829_p12 = scmp.ne.s32.totalorder %s2181_s6, %s1828_s29  ;;  %p1832_p13 = scmp.lt.u32.totalorder %s1828_s29, %s2181_s6 }
 0x36b   :  { %p1834_p0 = pnand %p1832_p13, %p1829_p12 }
 0x36d   :  { %1837 = shalt.err (!%p1834_p0)
}
 0x36e   :  { %970 = dma.vmem_to_hbm [thread:$0]  %s968_s26, 128, %s2181_s6, [#allocation8]  }
 0x36f   :  { %1844 = dma.done.wait [#allocation8], 128  }
 0x370   :  { %1845 = vsyncadd [#allocation8], 4294967168 }
 0x371   :  { %1846 = dma.done.wait [#allocation14], 16  }
 0x372   :  { %1847 = vsyncadd [#allocation14], 4294967280 }
 0x373   :  { %987 = vsyncpa [#allocation7], 1 }
 0x374   :  { %988 = vsyncpa [#allocation10], 1 }
 0x375   :  { %989 = vsyncpa [#allocation8], 1 }
 0x376   :  { %990 = vsyncpa [#allocation14], 1 }

</bundles_post_ra>
